<compile_context>
chip_gen: v5e
topology: v5e:2x2
jax: 0.10.0
libtpu: 0.0.40
codegen_flags: <defaults>
</compile_context>

<pallas_src>
import functools

import jax
import jax.numpy as jnp
import numpy as np
from jax import lax
from jax.experimental import pallas as pl
from jax.experimental.pallas import tpu as pltpu

NEG_INF = -1e30                       # finite "minus infinity" for padded class columns
_INT_MAX = int(np.iinfo(np.int32).max)


def _round_up(x, m):
    return (x + m - 1) // m * m


# --------------------------------------------------------------------------- hardware info
@functools.lru_cache(maxsize=1)
def _tpu_vmem_and_cores():
    """Returns (physical VMEM bytes per TensorCore, # TensorCores per chip)."""
    vmem, cores = None, 1
    try:
        info = pltpu.get_tpu_info()
        for name in ("vmem_capacity_bytes", "vmem_bytes", "vmem_size_bytes"):
            v = getattr(info, name, None)
            if v:
                vmem = int(v)
                break
        for name in ("num_tensorcores", "tensorcores_per_chip", "num_cores"):
            c = getattr(info, name, None)
            if c:
                cores = int(c)
                break
    except Exception:
        pass
    if vmem is None:
        kind = ""
        try:
            kind = jax.devices()[0].device_kind.lower()
        except Exception:
            pass
        if "v7" in kind:
            vmem, cores = 64 << 20, 2
        elif "v5" in kind or "v6" in kind:
            vmem, cores = 128 << 20, 1
        else:
            vmem, cores = 64 << 20, cores     # conservative default: fits every generation
    return vmem, cores


# --------------------------------------------------------------------------- tile planning
def _vmem_footprint(tb, tc, e_pad):
    """Conservative VMEM bytes for the kernel at tile sizes (tb, tc)."""
    x_blk = tb * e_pad * 4              # f32 x input block
    xn_blk = tb * e_pad * 4             # f32 normalized-x output block
    w_blk = e_pad * tc * 2              # bf16 W^T block
    b_blk = 8 * tc * 4                  # bias block (sublane-padded)
    t_blk = tb * 128 * 4                # targets (lane-padded)
    lp_blk = 2 * tb * 128 * 4           # loss + preds output blocks
    dbuf = 2 * (x_blk + xn_blk + w_blk + b_blk + t_blk + lp_blk)   # double-buffered pipeline
    scratch = tb * e_pad * 2 + 4 * tb * 128 * 4                    # bf16 x + 4 x (TB,1) state
    return dbuf + scratch


def ce_loss_plan(batch, embedding, n_classes, *, tb=None, tc=None):
    """Pick (TB, TC, E_pad) for this chip and problem size."""
    vmem, cores = _tpu_vmem_and_cores()
    budget = int(vmem * 0.70)
    e_pad = _round_up(max(embedding, 1), 128)

    if tb is None:
        target_tb = 512                 # W tile is re-streamed once per B tile: flops/byte == TB
        nb = max(1, -(-batch // target_tb))
        if cores > 1 and batch >= 512:
            nb = max(nb, cores)         # keep every TensorCore busy on the parallel B axis
        TB = max(8, _round_up(-(-batch // nb), 8))
    else:
        TB = int(tb)

    TC = int(tc) if tc is not None else min(1024, _round_up(max(n_classes, 1), 128))

    # Shrink auto-chosen tiles until the double-buffered footprint fits the chip's VMEM.
    while _vmem_footprint(TB, TC, e_pad) > budget:
        if tc is None and TC > 256:
            TC = max(256, TC // 2)
        elif tb is None and TB > 8:
            TB = max(8, _round_up(TB // 2, 8))
        else:
            break
    return TB, TC, e_pad


def prepare_ce_params(weight, bias, tc, e_pad):
    """One-time parameter prep: transpose to [E_pad, C_pad] bf16 and pad bias with NEG_INF.

    Do this once per parameter update and reuse the result — it is deliberately outside the
    per-forward jitted path (an HBM-to-HBM transpose + cast of the full weight otherwise
    rivals the kernel's own W traffic for vocab-scale C).
    """
    C, E = weight.shape
    c_pad = _round_up(C, tc)
    w_t = jnp.asarray(weight).T.astype(jnp.bfloat16)                 # [E, C] bf16
    w_t = jnp.pad(w_t, ((0, e_pad - E), (0, c_pad - C)))
    b_p = jnp.asarray(bias).astype(jnp.float32).reshape(1, C)
    # Padded classes get a huge negative bias -> exp() == 0, never an argmax winner.
    b_p = jnp.pad(b_p, ((0, 0), (0, c_pad - C)), constant_values=NEG_INF)
    return w_t, b_p


# --------------------------------------------------------------------------- kernel
def ce_loss_kernel(x_ref, w_ref, b_ref, t_ref,              # inputs
                   xn_ref, loss_ref, pred_ref,              # outputs
                   xbf_sc, m_sc, l_sc, tgt_sc, idx_sc):     # VMEM scratch
    k = pl.program_id(1)
    n_k = pl.num_programs(1)
    tb = x_ref.shape[0]
    tc = w_ref.shape[1]

    # ---- first C step: init online-softmax state, write F.normalize(x), hoist bf16(x) ----
    @pl.when(k == 0)
    def _init():
        x = x_ref[...].astype(jnp.float32)
        sq = jnp.sum(x * x, axis=1, keepdims=True)
        # x / max(||x||, 1e-12)  ==  x * rsqrt(max(||x||^2, 1e-24))   (rsqrt -> EUP slot)
        inv = lax.rsqrt(jnp.maximum(sq, 1e-24))
        xn_ref[...] = (x * inv).astype(xn_ref.dtype)
        xbf_sc[...] = x.astype(jnp.bfloat16)        # one cast per B tile, reused every C step
        m_sc[...] = jnp.full_like(m_sc, -jnp.inf)
        l_sc[...] = jnp.zeros_like(l_sc)
        tgt_sc[...] = jnp.zeros_like(tgt_sc)
        idx_sc[...] = jnp.zeros_like(idx_sc)

    # ---- logits tile: bf16 MXU matmul with f32 accumulation, f32 bias ----
    logits = jnp.dot(xbf_sc[...], w_ref[...], preferred_element_type=jnp.float32)
    logits = logits + b_ref[...]                                      # (tb, tc) f32

    col = lax.broadcasted_iota(jnp.int32, (tb, tc), 1)                # local class index 0..tc-1
    t_local = t_ref[...] - k * tc                                     # (tb, 1) target's local col

    # ---- online softmax (running max / sum-exp) ----
    tile_max = jnp.max(logits, axis=1, keepdims=True)                 # (tb, 1)
    m_old = m_sc[...]
    m_new = jnp.maximum(m_old, tile_max)
    alpha = jnp.exp(m_old - m_new)
    p_sum = jnp.sum(jnp.exp(logits - m_new), axis=1, keepdims=True)
    l_sc[...] = alpha * l_sc[...] + p_sum
    m_sc[...] = m_new

    # ---- argmax (first maximal index) across C tiles; k*tc added only to the (tb,1) result ----
    tile_idx = jnp.min(jnp.where(logits == tile_max, col, _INT_MAX), axis=1, keepdims=True)
    idx_sc[...] = jnp.where(tile_max > m_old, tile_idx + k * tc, idx_sc[...])

    # ---- target logit (exactly one C tile contains each valid target column) ----
    tgt_sc[...] += jnp.sum(jnp.where(col == t_local, logits, 0.0), axis=1, keepdims=True)

    # ---- last C step: finalize per-sample loss and preds (lane-dense stores) ----
    @pl.when(k == n_k - 1)
    def _finalize():
        lse = m_sc[...] + jnp.log(l_sc[...])                          # (tb, 1)
        per_sample = lse - tgt_sc[...]
        loss_ref[...] = jnp.broadcast_to(per_sample, loss_ref.shape)
        pred_ref[...] = jnp.broadcast_to(idx_sc[...], pred_ref.shape)


# --------------------------------------------------------------------------- forward
@functools.partial(jax.jit, static_argnames=("tb", "tc"))
def ce_loss_forward(x, targets, w_t, b_p, *, tb, tc):
    """x: [B, E] f32; targets: [B] int; w_t: [E_pad, C_pad] bf16; b_p: [1, C_pad] f32.

    Returns (normalized x [B, E] f32, preds [B] int32, mean CE loss scalar f32).
    """
    B, E = x.shape
    E_pad, C_pad = w_t.shape
    TB, TC = int(tb), int(tc)
    assert C_pad % TC == 0 and E_pad % 8 == 0
    B_pad = _round_up(B, TB)
    nb, nc = B_pad // TB, C_pad // TC

    x_p = x.astype(jnp.float32)
    if E_pad != E or B_pad != B:
        x_p = jnp.pad(x_p, ((0, B_pad - B), (0, E_pad - E)))
    t_p = targets.astype(jnp.int32).reshape(B, 1)
    if B_pad != B:
        t_p = jnp.pad(t_p, ((0, B_pad - B), (0, 0)))

    vmem, _ = _tpu_vmem_and_cores()
    footprint = _vmem_footprint(TB, TC, E_pad)
    vmem_limit = int(min(vmem * 15 // 16,
                         max(footprint * 5 // 4 + (2 << 20), 16 << 20)))

    cost = pl.CostEstimate(
        flops=2 * B_pad * E_pad * C_pad,
        transcendentals=B_pad * C_pad,
        bytes_accessed=int(2 * B_pad * E_pad * 4 + nb * E_pad * C_pad * 2
                           + nb * C_pad * 4 + B_pad * 4 + B_pad * 128 * 8),
    )

    xn_p, loss_ps, preds_p = pl.pallas_call(
        ce_loss_kernel,
        out_shape=(
            jax.ShapeDtypeStruct((B_pad, E_pad), jnp.float32),    # normalized x
            jax.ShapeDtypeStruct((B_pad, 128), jnp.float32),      # per-sample loss (lane bcast)
            jax.ShapeDtypeStruct((B_pad, 128), jnp.int32),        # preds (lane bcast)
        ),
        grid_spec=pltpu.PrefetchScalarGridSpec(
            num_scalar_prefetch=0,
            grid=(nb, nc),
            in_specs=[
                pl.BlockSpec((TB, E_pad), lambda i, k: (i, 0)),   # x (revisited across k)
                pl.BlockSpec((E_pad, TC), lambda i, k: (0, k)),   # W^T (bf16)
                pl.BlockSpec((1, TC), lambda i, k: (0, k)),       # bias
                pl.BlockSpec((TB, 1), lambda i, k: (i, 0)),       # targets
            ],
            out_specs=(
                pl.BlockSpec((TB, E_pad), lambda i, k: (i, 0)),
                pl.BlockSpec((TB, 128), lambda i, k: (i, 0)),
                pl.BlockSpec((TB, 128), lambda i, k: (i, 0)),
            ),
            scratch_shapes=[
                pltpu.VMEM((TB, E_pad), jnp.bfloat16),  # hoisted bf16 x (one cast per B tile)
                pltpu.VMEM((TB, 1), jnp.float32),       # running max m
                pltpu.VMEM((TB, 1), jnp.float32),       # running sum-exp l
                pltpu.VMEM((TB, 1), jnp.float32),       # target logit
                pltpu.VMEM((TB, 1), jnp.int32),         # argmax index
            ],
        ),
        compiler_params=pltpu.CompilerParams(
            dimension_semantics=("parallel", "arbitrary"),
            vmem_limit_bytes=vmem_limit,
        ),
        cost_estimate=cost,
    )(x_p, w_t, b_p, t_p)

    xn = xn_p[:B, :E]
    preds = preds_p[:B, 0]
    loss = jnp.mean(loss_ps[:B, 0])
    return xn, preds, loss


def ce_loss(x, targets, weight, bias, *, tb=None, tc=None):
    """Convenience path (plans tiles and prepares parameters per call).

    For repeated forward passes, call ce_loss_plan / prepare_ce_params once and reuse.
    """
    B, E = x.shape
    C = weight.shape[0]
    TB, TC, e_pad = ce_loss_plan(B, E, C, tb=tb, tc=tc)
    w_t, b_p = prepare_ce_params(weight, bias, TC, e_pad)
    return ce_loss_forward(x, targets, w_t, b_p, tb=TB, tc=TC)


# --------------------------------------------------------------------------- reference
def ref_forward(x, targets, weight, bias):
    """Pure-JAX reference with the same bf16 weight/activation quantization for the matmul."""
    x_q = x.astype(jnp.bfloat16).astype(jnp.float32)
    w_q = weight.T.astype(jnp.bfloat16).astype(jnp.float32)
    logits = x_q @ w_q + bias
    preds = jnp.argmax(logits, axis=1)
    logp = jax.nn.log_softmax(logits, axis=1)
    loss = -jnp.mean(logp[jnp.arange(x.shape[0]), targets])
    xn = x / jnp.maximum(jnp.linalg.norm(x, axis=1, keepdims=True), 1e-12)
    return xn, preds, loss


if __name__ == "__main__":
    key = jax.random.PRNGKey(0)
    kx, kw, kb, kt = jax.random.split(key, 4)

    # ---- test 1: module-scale shapes (B=2, E=32, C=10); params prepared once and reused ----
    B, E, C = 2, 32, 10
    bound = 1.0 / np.sqrt(E)
    weight = jax.random.uniform(kw, (C, E), jnp.float32, -bound, bound)
    bias = jax.random.uniform(kb, (C,), jnp.float32, -bound, bound)
    x = jax.random.normal(kx, (B, E), jnp.float32)
    targets = jax.random.randint(kt, (B,), 0, C, jnp.int32)

    TB, TC, e_pad = ce_loss_plan(B, E, C)
    w_t, b_p = prepare_ce_params(weight, bias, TC, e_pad)     # one-time parameter prep
    xn, preds, loss = ce_loss_forward(x, targets, w_t, b_p, tb=TB, tc=TC)
    jax.block_until_ready((xn, preds, loss))

    xn_r, preds_r, loss_r = ref_forward(x, targets, weight, bias)
    np.testing.assert_allclose(np.asarray(xn), np.asarray(xn_r), rtol=1e-5, atol=1e-5)
    np.testing.assert_array_equal(np.asarray(preds), np.asarray(preds_r))
    np.testing.assert_allclose(np.asarray(loss), np.asarray(loss_r), rtol=1e-4, atol=1e-4)

    # ---- test 2: B padding (12 -> 16), 2 B-tiles x 3 C-tiles, exercises the online C reduction ----
    B2, E2, C2 = 12, 128, 300
    k2 = jax.random.split(jax.random.PRNGKey(0), 4)
    bound2 = 1.0 / np.sqrt(E2)
    w2 = jax.random.uniform(k2[0], (C2, E2), jnp.float32, -bound2, bound2)
    b2 = jax.random.uniform(k2[1], (C2,), jnp.float32, -bound2, bound2)
    x2 = jax.random.normal(k2[2], (B2, E2), jnp.float32)
    t2 = jax.random.randint(k2[3], (B2,), 0, C2, jnp.int32)

    xn2, p2, l2 = ce_loss(x2, t2, w2, b2, tb=8, tc=128)
    jax.block_until_ready((xn2, p2, l2))
    xn2_r, p2_r, l2_r = ref_forward(x2, t2, w2, b2)
    np.testing.assert_allclose(np.asarray(xn2), np.asarray(xn2_r), rtol=1e-5, atol=1e-5)
    np.testing.assert_array_equal(np.asarray(p2), np.asarray(p2_r))
    np.testing.assert_allclose(np.asarray(l2), np.asarray(l2_r), rtol=1e-4, atol=1e-4)

    print("KERNEL_OK")
</pallas_src>

<mosaic_0001>
module attributes {stable_mosaic.version = 11 : i64} {
  func.func @ce_loss_kernel(%arg0: i32, %arg1: i32, %arg2: memref<8x128xf32, #tpu.memory_space<vmem>>, %arg3: memref<128x128xbf16, #tpu.memory_space<vmem>>, %arg4: memref<1x128xf32, #tpu.memory_space<vmem>>, %arg5: memref<8x1xi32, #tpu.memory_space<vmem>>, %arg6: memref<8x128xf32, #tpu.memory_space<vmem>>, %arg7: memref<8x128xf32, #tpu.memory_space<vmem>>, %arg8: memref<8x128xi32, #tpu.memory_space<vmem>>, %arg9: memref<8x128xbf16, #tpu.memory_space<vmem>>, %arg10: memref<8x1xf32, #tpu.memory_space<vmem>>, %arg11: memref<8x1xf32, #tpu.memory_space<vmem>>, %arg12: memref<8x1xf32, #tpu.memory_space<vmem>>, %arg13: memref<8x1xi32, #tpu.memory_space<vmem>>) attributes {dimension_semantics = [#tpu.dimension_semantics<parallel>, #tpu.dimension_semantics<arbitrary>], iteration_bounds = array<i64: 1, 1>, scalar_prefetch = 0 : i64, scratch_operands = 5 : i64, tpu.core_type = #tpu.core_type<tc>, window_params = [{transform_indices = @transform_0, window_bounds = array<i64: 8, 128>}, {transform_indices = @transform_1, window_bounds = array<i64: 128, 128>}, {transform_indices = @transform_2, window_bounds = array<i64: 1, 128>}, {transform_indices = @transform_3, window_bounds = array<i64: 8, 1>}, {transform_indices = @transform_4, window_bounds = array<i64: 8, 128>}, {transform_indices = @transform_5, window_bounds = array<i64: 8, 128>}, {transform_indices = @transform_6, window_bounds = array<i64: 8, 128>}]} {
    %c0_i32 = arith.constant 0 : i32
    %0 = arith.cmpi eq, %arg1, %c0_i32 : i32
    %1 = arith.extui %0 : i1 to i32
    %c0_i32_0 = arith.constant 0 : i32
    %2 = arith.cmpi ne, %1, %c0_i32_0 : i32
    scf.if %2 {
      %c0_32 = arith.constant 0 : index
      %c0_33 = arith.constant 0 : index
      %55 = vector.load %arg2[%c0_32, %c0_33] : memref<8x128xf32, #tpu.memory_space<vmem>>, vector<8x128xf32>
      %56 = arith.mulf %55, %55 : vector<8x128xf32>
      %cst_34 = arith.constant dense<0.000000e+00> : vector<8xf32>
      %57 = vector.multi_reduction <add>, %56, %cst_34 [1] : vector<8x128xf32> to vector<8xf32>
      %58 = vector.shape_cast %57 : vector<8xf32> to vector<8x1xf32>
      %cst_35 = arith.constant 1.000000e-24 : f32
      %59 = vector.broadcast %cst_35 : f32 to vector<8x1xf32>
      %60 = arith.maximumf %58, %59 : vector<8x1xf32>
      %61 = math.rsqrt %60 : vector<8x1xf32>
      %62 = vector.broadcast %61 : vector<8x1xf32> to vector<8x128xf32>
      %63 = arith.mulf %55, %62 : vector<8x128xf32>
      %c0_36 = arith.constant 0 : index
      %c0_37 = arith.constant 0 : index
      %64 = vector.load %arg6[%c0_36, %c0_37] : memref<8x128xf32, #tpu.memory_space<vmem>>, vector<8x128xf32>
      tpu.vector_store %arg6[%c0_36, %c0_37], %63 {strides = array<i32>} : memref<8x128xf32, #tpu.memory_space<vmem>>, vector<8x128xf32>,
      %65 = arith.truncf %55 : vector<8x128xf32> to vector<8x128xbf16>
      %c0_38 = arith.constant 0 : index
      %c0_39 = arith.constant 0 : index
      %66 = vector.load %arg9[%c0_38, %c0_39] : memref<8x128xbf16, #tpu.memory_space<vmem>>, vector<8x128xbf16>
      tpu.vector_store %arg9[%c0_38, %c0_39], %65 {strides = array<i32>} : memref<8x128xbf16, #tpu.memory_space<vmem>>, vector<8x128xbf16>,
      %cst_40 = arith.constant 0xFF800000 : f32
      %67 = vector.broadcast %cst_40 : f32 to vector<8x1xf32>
      %c0_41 = arith.constant 0 : index
      %c0_42 = arith.constant 0 : index
      %68 = vector.load %arg10[%c0_41, %c0_42] : memref<8x1xf32, #tpu.memory_space<vmem>>, vector<8x1xf32>
      tpu.vector_store %arg10[%c0_41, %c0_42], %67 {strides = array<i32>} : memref<8x1xf32, #tpu.memory_space<vmem>>, vector<8x1xf32>,
      %cst_43 = arith.constant 0.000000e+00 : f32
      %69 = vector.broadcast %cst_43 : f32 to vector<8x1xf32>
      %c0_44 = arith.constant 0 : index
      %c0_45 = arith.constant 0 : index
      %70 = vector.load %arg11[%c0_44, %c0_45] : memref<8x1xf32, #tpu.memory_space<vmem>>, vector<8x1xf32>
      tpu.vector_store %arg11[%c0_44, %c0_45], %69 {strides = array<i32>} : memref<8x1xf32, #tpu.memory_space<vmem>>, vector<8x1xf32>,
      %cst_46 = arith.constant 0.000000e+00 : f32
      %71 = vector.broadcast %cst_46 : f32 to vector<8x1xf32>
      %c0_47 = arith.constant 0 : index
      %c0_48 = arith.constant 0 : index
      %72 = vector.load %arg12[%c0_47, %c0_48] : memref<8x1xf32, #tpu.memory_space<vmem>>, vector<8x1xf32>
      tpu.vector_store %arg12[%c0_47, %c0_48], %71 {strides = array<i32>} : memref<8x1xf32, #tpu.memory_space<vmem>>, vector<8x1xf32>,
      %c0_i32_49 = arith.constant 0 : i32
      %73 = vector.broadcast %c0_i32_49 : i32 to vector<8x1xi32>
      %c0_50 = arith.constant 0 : index
      %c0_51 = arith.constant 0 : index
      %74 = vector.load %arg13[%c0_50, %c0_51] : memref<8x1xi32, #tpu.memory_space<vmem>>, vector<8x1xi32>
      tpu.vector_store %arg13[%c0_50, %c0_51], %73 {strides = array<i32>} : memref<8x1xi32, #tpu.memory_space<vmem>>, vector<8x1xi32>,
    } else {
    }
    %c0 = arith.constant 0 : index
    %c0_1 = arith.constant 0 : index
    %3 = vector.load %arg9[%c0, %c0_1] : memref<8x128xbf16, #tpu.memory_space<vmem>>, vector<8x128xbf16>
    %c0_2 = arith.constant 0 : index
    %c0_3 = arith.constant 0 : index
    %4 = vector.load %arg3[%c0_2, %c0_3] : memref<128x128xbf16, #tpu.memory_space<vmem>>, vector<128x128xbf16>
    %cst = arith.constant dense<0.000000e+00> : vector<8x128xf32>
    %5 = tpu.matmul %3, %4, %cst {dimension_numbers = #tpu.dot_dimension_numbers<[1], [0], [0], [1], [0, 0, 1, 1], [], []>} : vector<8x128xbf16>, vector<128x128xbf16>, vector<8x128xf32> -> vector<8x128xf32>
    %c0_4 = arith.constant 0 : index
    %c0_5 = arith.constant 0 : index
    %6 = vector.load %arg4[%c0_4, %c0_5] : memref<1x128xf32, #tpu.memory_space<vmem>>, vector<1x128xf32>
    %7 = vector.broadcast %6 : vector<1x128xf32> to vector<8x128xf32>
    %8 = arith.addf %5, %7 : vector<8x128xf32>
    %9 = tpu.iota {dimensions = array<i32: 1>} : vector<8x128xi32>
    %c0_6 = arith.constant 0 : index
    %c0_7 = arith.constant 0 : index
    %10 = vector.load %arg5[%c0_6, %c0_7] : memref<8x1xi32, #tpu.memory_space<vmem>>, vector<8x1xi32>
    %c128_i32 = arith.constant 128 : i32
    %11 = arith.muli %arg1, %c128_i32 : i32
    %12 = vector.broadcast %11 : i32 to vector<8x1xi32>
    %13 = arith.subi %10, %12 : vector<8x1xi32>
    %cst_8 = arith.constant dense<0xFF800000> : vector<8xf32>
    %14 = vector.multi_reduction <maximumf>, %8, %cst_8 [1] : vector<8x128xf32> to vector<8xf32>
    %15 = vector.shape_cast %14 : vector<8xf32> to vector<8x1xf32>
    %c0_9 = arith.constant 0 : index
    %c0_10 = arith.constant 0 : index
    %16 = vector.load %arg10[%c0_9, %c0_10] : memref<8x1xf32, #tpu.memory_space<vmem>>, vector<8x1xf32>
    %17 = arith.maximumf %16, %15 : vector<8x1xf32>
    %18 = arith.subf %16, %17 : vector<8x1xf32>
    %19 = math.exp %18 : vector<8x1xf32>
    %20 = vector.broadcast %17 : vector<8x1xf32> to vector<8x128xf32>
    %21 = arith.subf %8, %20 : vector<8x128xf32>
    %22 = math.exp %21 : vector<8x128xf32>
    %cst_11 = arith.constant dense<0.000000e+00> : vector<8xf32>
    %23 = vector.multi_reduction <add>, %22, %cst_11 [1] : vector<8x128xf32> to vector<8xf32>
    %24 = vector.shape_cast %23 : vector<8xf32> to vector<8x1xf32>
    %c0_12 = arith.constant 0 : index
    %c0_13 = arith.constant 0 : index
    %25 = vector.load %arg11[%c0_12, %c0_13] : memref<8x1xf32, #tpu.memory_space<vmem>>, vector<8x1xf32>
    %26 = arith.mulf %19, %25 : vector<8x1xf32>
    %27 = arith.addf %26, %24 : vector<8x1xf32>
    %c0_14 = arith.constant 0 : index
    %c0_15 = arith.constant 0 : index
    %28 = vector.load %arg11[%c0_14, %c0_15] : memref<8x1xf32, #tpu.memory_space<vmem>>, vector<8x1xf32>
    tpu.vector_store %arg11[%c0_14, %c0_15], %27 {strides = array<i32>} : memref<8x1xf32, #tpu.memory_space<vmem>>, vector<8x1xf32>,
    %c0_16 = arith.constant 0 : index
    %c0_17 = arith.constant 0 : index
    %29 = vector.load %arg10[%c0_16, %c0_17] : memref<8x1xf32, #tpu.memory_space<vmem>>, vector<8x1xf32>
    tpu.vector_store %arg10[%c0_16, %c0_17], %17 {strides = array<i32>} : memref<8x1xf32, #tpu.memory_space<vmem>>, vector<8x1xf32>,
    %30 = vector.broadcast %15 : vector<8x1xf32> to vector<8x128xf32>
    %31 = arith.cmpf oeq, %8, %30 : vector<8x128xf32>
    %c2147483647_i32 = arith.constant 2147483647 : i32
    %32 = vector.broadcast %c2147483647_i32 : i32 to vector<8x128xi32>
    %33 = arith.select %31, %9, %32 : vector<8x128xi1>, vector<8x128xi32>
    %cst_18 = arith.constant dense<2147483647> : vector<8xi32>
    %34 = vector.multi_reduction <minsi>, %33, %cst_18 [1] : vector<8x128xi32> to vector<8xi32>
    %35 = vector.shape_cast %34 : vector<8xi32> to vector<8x1xi32>
    %36 = arith.cmpf ogt, %15, %16 : vector<8x1xf32>
    %c128_i32_19 = arith.constant 128 : i32
    %37 = arith.muli %arg1, %c128_i32_19 : i32
    %38 = vector.broadcast %37 : i32 to vector<8x1xi32>
    %39 = arith.addi %35, %38 : vector<8x1xi32>
    %c0_20 = arith.constant 0 : index
    %c0_21 = arith.constant 0 : index
    %40 = vector.load %arg13[%c0_20, %c0_21] : memref<8x1xi32, #tpu.memory_space<vmem>>, vector<8x1xi32>
    %41 = arith.select %36, %39, %40 : vector<8x1xi1>, vector<8x1xi32>
    %c0_22 = arith.constant 0 : index
    %c0_23 = arith.constant 0 : index
    %42 = vector.load %arg13[%c0_22, %c0_23] : memref<8x1xi32, #tpu.memory_space<vmem>>, vector<8x1xi32>
    tpu.vector_store %arg13[%c0_22, %c0_23], %41 {strides = array<i32>} : memref<8x1xi32, #tpu.memory_space<vmem>>, vector<8x1xi32>,
    %c0_24 = arith.constant 0 : index
    %c0_25 = arith.constant 0 : index
    %43 = vector.load %arg12[%c0_24, %c0_25] : memref<8x1xf32, #tpu.memory_space<vmem>>, vector<8x1xf32>
    %44 = vector.broadcast %13 : vector<8x1xi32> to vector<8x128xi32>
    %45 = arith.cmpi eq, %9, %44 : vector<8x128xi32>
    %cst_26 = arith.constant 0.000000e+00 : f32
    %46 = vector.broadcast %cst_26 : f32 to vector<8x128xf32>
    %47 = arith.select %45, %8, %46 : vector<8x128xi1>, vector<8x128xf32>
    %cst_27 = arith.constant dense<0.000000e+00> : vector<8xf32>
    %48 = vector.multi_reduction <add>, %47, %cst_27 [1] : vector<8x128xf32> to vector<8xf32>
    %49 = vector.shape_cast %48 : vector<8xf32> to vector<8x1xf32>
    %50 = arith.addf %43, %49 : vector<8x1xf32>
    %c0_28 = arith.constant 0 : index
    %c0_29 = arith.constant 0 : index
    %51 = vector.load %arg12[%c0_28, %c0_29] : memref<8x1xf32, #tpu.memory_space<vmem>>, vector<8x1xf32>
    tpu.vector_store %arg12[%c0_28, %c0_29], %50 {strides = array<i32>} : memref<8x1xf32, #tpu.memory_space<vmem>>, vector<8x1xf32>,
    %c0_i32_30 = arith.constant 0 : i32
    %52 = arith.cmpi eq, %arg1, %c0_i32_30 : i32
    %53 = arith.extui %52 : i1 to i32
    %c0_i32_31 = arith.constant 0 : i32
    %54 = arith.cmpi ne, %53, %c0_i32_31 : i32
    scf.if %54 {
      %c0_32 = arith.constant 0 : index
      %c0_33 = arith.constant 0 : index
      %55 = vector.load %arg10[%c0_32, %c0_33] : memref<8x1xf32, #tpu.memory_space<vmem>>, vector<8x1xf32>
      %c0_34 = arith.constant 0 : index
      %c0_35 = arith.constant 0 : index
      %56 = vector.load %arg11[%c0_34, %c0_35] : memref<8x1xf32, #tpu.memory_space<vmem>>, vector<8x1xf32>
      %57 = math.log %56 : vector<8x1xf32>
      %58 = arith.addf %55, %57 : vector<8x1xf32>
      %c0_36 = arith.constant 0 : index
      %c0_37 = arith.constant 0 : index
      %59 = vector.load %arg12[%c0_36, %c0_37] : memref<8x1xf32, #tpu.memory_space<vmem>>, vector<8x1xf32>
      %60 = arith.subf %58, %59 : vector<8x1xf32>
      %61 = vector.shape_cast %60 : vector<8x1xf32> to vector<8x1xf32>
      %62 = vector.broadcast %61 : vector<8x1xf32> to vector<8x128xf32>
      %c0_38 = arith.constant 0 : index
      %c0_39 = arith.constant 0 : index
      %63 = vector.load %arg7[%c0_38, %c0_39] : memref<8x128xf32, #tpu.memory_space<vmem>>, vector<8x128xf32>
      tpu.vector_store %arg7[%c0_38, %c0_39], %62 {strides = array<i32>} : memref<8x128xf32, #tpu.memory_space<vmem>>, vector<8x128xf32>,
      %c0_40 = arith.constant 0 : index
      %c0_41 = arith.constant 0 : index
      %64 = vector.load %arg13[%c0_40, %c0_41] : memref<8x1xi32, #tpu.memory_space<vmem>>, vector<8x1xi32>
      %65 = vector.shape_cast %64 : vector<8x1xi32> to vector<8x1xi32>
      %66 = vector.broadcast %65 : vector<8x1xi32> to vector<8x128xi32>
      %c0_42 = arith.constant 0 : index
      %c0_43 = arith.constant 0 : index
      %67 = vector.load %arg8[%c0_42, %c0_43] : memref<8x128xi32, #tpu.memory_space<vmem>>, vector<8x128xi32>
      tpu.vector_store %arg8[%c0_42, %c0_43], %66 {strides = array<i32>} : memref<8x128xi32, #tpu.memory_space<vmem>>, vector<8x128xi32>,
    } else {
    }
    return
  }
  func.func @transform_0(%arg0: i32, %arg1: i32) -> (i32, i32) {
    %c0_i32 = arith.constant 0 : i32
    %c0_i32_0 = arith.constant 0 : i32
    return %arg0, %c0_i32 : i32, i32
  }
  func.func @transform_1(%arg0: i32, %arg1: i32) -> (i32, i32) {
    %c0_i32 = arith.constant 0 : i32
    %c0_i32_0 = arith.constant 0 : i32
    return %c0_i32, %arg1 : i32, i32
  }
  func.func @transform_2(%arg0: i32, %arg1: i32) -> (i32, i32) {
    %c0_i32 = arith.constant 0 : i32
    %c0_i32_0 = arith.constant 0 : i32
    return %c0_i32, %arg1 : i32, i32
  }
  func.func @transform_3(%arg0: i32, %arg1: i32) -> (i32, i32) {
    %c0_i32 = arith.constant 0 : i32
    %c0_i32_0 = arith.constant 0 : i32
    return %arg0, %c0_i32 : i32, i32
  }
  func.func @transform_4(%arg0: i32, %arg1: i32) -> (i32, i32) {
    %c0_i32 = arith.constant 0 : i32
    %c0_i32_0 = arith.constant 0 : i32
    return %arg0, %c0_i32 : i32, i32
  }
  func.func @transform_5(%arg0: i32, %arg1: i32) -> (i32, i32) {
    %c0_i32 = arith.constant 0 : i32
    %c0_i32_0 = arith.constant 0 : i32
    return %arg0, %c0_i32 : i32, i32
  }
  func.func @transform_6(%arg0: i32, %arg1: i32) -> (i32, i32) {
    %c0_i32 = arith.constant 0 : i32
    %c0_i32_0 = arith.constant 0 : i32
    return %arg0, %c0_i32 : i32, i32
  }
}

</mosaic_0001>

<bundles_post_ra>
// kernel: ce_loss_forward.1
= control target key start
LH: loop header
LB: loop body
LE: loop exit
PB: predicated region body
PF: predicated region fallthrough
CT: control target
= control target key end

     0   :  { %12 = vsyncpa [#allocation8], 0  ;;  %s324_s24 = smov [#allocation7]   ;;  %s325_s26 = smov 64   ;;  %s401_s0 = inlined_call_operand.vmem [shape: f32[8,128], index: 0, kind: input, shape index: {}]   ;;  %s402_s1 = inlined_call_operand.hbm [shape: bf16[128,128], index: 1, kind: input, shape index: {}]   ;;  %s403_s2 = inlined_call_operand.vmem [shape: f32[1,128], index: 2, kind: input, shape index: {}]   ;;  %s404_s3 = inlined_call_operand.vmem [shape: s32[8,1], index: 3, kind: input, shape index: {}]   ;;  %s405_s4 = inlined_call_operand.vmem [shape: f32[8,128], index: 4, kind: output, shape index: {0}]   ;;  %s406_s5 = inlined_call_operand.vmem [shape: f32[8,128], index: 5, kind: output, shape index: {1}]   ;;  %s407_s6 = inlined_call_operand.vmem [shape: s32[8,128], index: 6, kind: output, shape index: {2}]  }
   0x1   :  { %s19_s23 = sshll.u32 %s402_s1, 4  ;;  %s21_s25 = sshll.u32 %s324_s24, 4  ;;  %s20_s23 = int_to_ptr.hbm [resolvable:$true] %s19_s23  ;;  %s22_s25 = int_to_ptr.vmem [resolvable:$true] %s21_s25 }
   0x2   :  { %s326_s27 = smov 4  }
   0x3   :  { %27 = dma.hbm_to_vmem [thread:$0]  %s20_s23, 1024, %s22_s25, [#allocation8], %s325_s26, %s325_s26, %s326_s27  }
   0x4   :  { %322 = dma.done.wait [#allocation8], 1024  }
   0x5   :  { %323 = vsyncadd [#allocation8], 4294966272  ;;  %v279_v0 = vld [vmem:[#allocation7 + $0x38] sm:$0xff]  ;;  %v278_v1 = vld [vmem:[#allocation7 + $0x30] sm:$0xff]  ;;  %vm59_vm0 = vcmask 7168   ;;  %v327_v11 = vmov -inf   ;;  %v146_v18 = vlaneseq }
   0x6   :  { %133 = vmatpush.bf16.msra.mxu0 %v279_v0  ;;  %v371_v2 = vld [vmem:[%s401_s0] sm:$0xff]  ;;  %v277_v4 = vld [vmem:[#allocation7 + $0x28] sm:$0xff]  ;;  %v274_v7 = vld [vmem:[#allocation7 + $0x10] sm:$0xff]  ;;  %60 = vst.msk [vmem:[#allocation3] sm:$0xff] %vm59_vm0, %v327_v11  ;;  %v328_v16 = vmov 0   ;;  %v329_v17 = vmov 0.0  }
   0x7   :  { %v57_v3 = vpack.c.bf16 %v371_v2, %v371_v2  ;;  %v276_v5 = vld [vmem:[#allocation7 + $0x20] sm:$0xff]  ;;  %v275_v6 = vld [vmem:[#allocation7 + $0x18] sm:$0xff]  ;;  %v273_v8 = vld [vmem:[#allocation7 + $0x8] sm:$0xff]  ;;  %286 = vset.pattern.permute.xlu0 %v328_v16  ;;  %63 = vst.msk [vmem:[#allocation6] sm:$0xff] %vm59_vm0, %v328_v16  ;;  %287 = vset.pattern.permute.xlu1 %v328_v16  ;;  %v147_v20 = vand.u32 127, %v146_v18  ;;  %v41_v38 = vmul.f32 %v371_v2, %v371_v2 }
   0x8   :  { %v272_v9 = vld [vmem:[#allocation7] sm:$0xff]  ;;  %v289_v12 = vld [vmem:[%s403_s2] ss:$0 sm:$0xff]  ;;  %288 = vset.pattern.permute.xlu2 %v328_v16  ;;  %61 = vst.msk [vmem:[#allocation4] sm:$0xff] %vm59_vm0, %v329_v17 }
   0x9   :  { %58 = vst [vmem:[#allocation2] sm:$0xf] %v57_v3  ;;  %v148_v27 = vld [vmem:[%s404_s3] sm:$0xff] }
   0xa   :  { %134 = vmatpush.bf16.msra.mxu0 %v278_v1  ;;  %62 = vst.msk [vmem:[#allocation5] sm:$0xff] %vm59_vm0, %v329_v17 }
   0xd   :  { %v154_v19 = vld [vmem:[#allocation3] sm:$0xff] }
   0xe   :  { %135 = vmatpush.bf16.msra.mxu0 %v277_v4  ;;  %v193_v49 = vld [vmem:[#allocation6] sm:$0xff] }
   0xf   :  { %v169_v41 = vld [vmem:[#allocation4] sm:$0xff] }
  0x10   :  { %v64_v10 = vld [vmem:[#allocation2] sm:$0xf] }
  0x11   :  { %v196_v53 = vld [vmem:[#allocation5] sm:$0xff] }
  0x12   :  { %136 = vmatpush.bf16.msra.mxu0 %v276_v5 }
  0x16   :  { %137 = vmatpush.bf16.msra.mxu0 %v275_v6 }
  0x1a   :  { %138 = vmatpush.bf16.msra.mxu0 %v274_v7 }
  0x1e   :  { %139 = vmatpush.bf16.msra.mxu0 %v273_v8 }
  0x22   :  { %140 = vmatpush.bf16.msra.mxu0 %v272_v9 }
  0x25   :  { %141 = vmatmul.bf16.vlgmr.msra.gmra.mxu0 %v64_v10 }
  0xa2   :  { %v142_v13 = vpop.f32.mrf.mxu0 }
  0xa3   :  { %v143_v14 = vadd.f32 %v289_v12, %v142_v13 }
  0xa5   :  { %152 = vmax.xlane.f32.xlu0 %v143_v14 }
  0xaa   :  { %v144_v15 = vpop.f32.mrf.mxu0 }
 0x118   :  { %v153_v21 = vpop.xlane.xlu0 %152 }
 0x119   :  { %v155_v22 = vmax.f32 %v154_v19, %v153_v21  ;;  %vm175_vm1 = vcmp.eq.f32.partialorder %v143_v14, %v153_v21  ;;  %vm191_vm4 = vcmp.gt.f32.partialorder %v153_v21, %v154_v19 }
 0x11a   :  { %v176_v23 = vsel %vm175_vm1, %v147_v20, 2147483647 }
 0x11b   :  { %v156_v24 = vsub.f32 %v154_v19, %v155_v22  ;;  %174 = vst.msk [vmem:[#allocation3] sm:$0xff] %vm59_vm0, %v155_v22  ;;  %161 = vperm.xlu0 %286, %v155_v22   ;;  %v178_v25 = vshra.s32 %v176_v23, 16  ;;  %v177_v33 = vand.u32 65535, %v176_v23 }
 0x11d   :  { %v180_v26 = vcvt.s32.f32 %v178_v25  ;;  %v179_v34 = vcvt.s32.f32 %v177_v33  ;;  %v157_v39 = vmul.f32 1.442695, %v156_v24 }
 0x11f   :  { %181 = vmin.xlane.f32.xlu1 %v180_v26 }
 0x122   :  { %v209_v59 = vld [vmem:[#allocation3] sm:$0xff] }
 0x138   :  { %198 = vperm.xlu1 %287, %v148_v27  }
 0x18d   :  { %v162_v28 = vpop.permute.xlu0 %161 }
 0x18e   :  { %v164_v29 = vsub.f32 %v143_v14, %v162_v28 }
 0x190   :  { %v165_v30 = vmul.f32 1.442695, %v164_v29 }
 0x192   :  { %290 = vpow2.f32 %v165_v30  ;;  %v182_v32 = vpop.xlane.xlu1 %181 }
 0x193   :  { %vm183_vm2 = vcmp.eq.f32.partialorder %v180_v26, %v182_v32  ;;  %292 = vpow2.f32 %v157_v39  ;;  %v188_v45 = vcvt.f32.s32 %v182_v32 }
 0x194   :  { %v184_v35 = vsel %vm183_vm2, %v179_v34, inf }
 0x195   :  { %v189_v47 = vshll.u32 %v188_v45, 16 }
 0x198   :  { %v291_v31 = vpop.eup %290 }
 0x199   :  { %167 = vadd.xlane.f32.xlu2 %v291_v31  ;;  %v293_v40 = vpop.eup %292 }
 0x19a   :  { %v170_v42 = vmul.f32 %v293_v40, %v169_v41 }
 0x1a1   :  { %185 = vmin.xlane.f32.xlu2 %v184_v35 }
 0x1aa   :  { %v199_v36 = vpop.permute.xlu1 %198 }
 0x1ab   :  { %vm200_vm3 = vcmp.eq.s32.totalorder %v147_v20, %v199_v36 }
 0x1ac   :  { %v201_v37 = vsel %vm200_vm3, %v143_v14, 0.0 }
 0x1ad   :  { %202 = vadd.xlane.f32.xlu2 %v201_v37 }
 0x1b5   :  { %42 = vadd.xlane.f32.xlu2 %v41_v38 }
 0x20c   :  { %v168_v43 = vpop.xlane.xlu2 %167 }
 0x20d   :  { %v171_v44 = vadd.f32 %v170_v42, %v168_v43 }
 0x20f   :  { %173 = vst.msk [vmem:[#allocation4] sm:$0xff] %vm59_vm0, %v171_v44 }
 0x214   :  { %v186_v46 = vpop.xlane.xlu2 %185 }
 0x215   :  { %v187_v48 = vcvt.f32.s32 %v186_v46 }
 0x216   :  { %v210_v52 = vld [vmem:[#allocation4] sm:$0xff] }
 0x217   :  { %v190_v50 = vadd.s32 %v189_v47, %v187_v48  ;;  %294 = vlog2.f32 %v210_v52 }
 0x219   :  { %v194_v51 = vsel %vm191_vm4, %v190_v50, %v193_v49 }
 0x21a   :  { %195 = vst.msk [vmem:[#allocation6] sm:$0xff] %vm59_vm0, %v194_v51 }
 0x21d   :  { %v295_v57 = vpop.eup %294 }
 0x21e   :  { %v212_v58 = vmul.f32 0.6931472, %v295_v57 }
 0x220   :  { %v203_v54 = vpop.xlane.xlu2 %202  ;;  %v213_v61 = vadd.f32 %v212_v58, %v209_v59 }
 0x221   :  { %v204_v55 = vadd.f32 %v203_v54, %v196_v53  ;;  %v222_v56 = vld [vmem:[#allocation6] sm:$0xff] }
 0x222   :  { %224 = vperm.xlu1 %287, %v222_v56  }
 0x223   :  { %205 = vst.msk [vmem:[#allocation5] sm:$0xff] %vm59_vm0, %v204_v55 }
 0x228   :  { %v43_v60 = vpop.xlane.xlu2 %42 }
 0x229   :  { %v44_v62 = vmax.f32 %v43_v60, 1e-24 }
 0x22a   :  { %v214_v63 = vld [vmem:[#allocation5] sm:$0xff] }
 0x22b   :  { %v215_v0 = vsub.f32 %v213_v61, %v214_v63  ;;  %296 = vrsqrt.f32 %v44_v62  ;;  %vm51_vm5 = vweird.f32 %v44_v62 }
 0x22d   :  { %218 = vperm.xlu2 %288, %v215_v0  }
 0x231   :  { %v297_v1 = vpop.eup %296 }
 0x232   :  { %v46_v3 = vmul.f32 %v297_v1, %v44_v62  ;;  %vm52_vm6 = vweird.f32 %v297_v1 }
 0x233   :  { %vm53_vm7 = vmor %vm51_vm5, %vm52_vm6 }
 0x234   :  { %v47_v4 = vmul.f32 %v297_v1, %v46_v3 }
 0x236   :  { %v48_v5 = vmul.f32 0.5, %v47_v4 }
 0x238   :  { %v49_v6 = vsub.f32 1.5, %v48_v5 }
 0x23a   :  { %v50_v7 = vmul.f32 %v297_v1, %v49_v6 }
 0x23c   :  { %v54_v8 = vsel %vm53_vm7, %v297_v1, %v50_v7 }
 0x23d   :  { %v55_v9 = vmul.f32 %v54_v8, %v371_v2 }
 0x23f   :  { %56 = vst [vmem:[%s405_s4] sm:$0xff] %v55_v9 }
 0x287   :  { %v219_v10 = vpop.permute.xlu2 %218 }
 0x288   :  { %221 = vst [vmem:[%s406_s5] sm:$0xff] %v219_v10 }
 0x294   :  { %v225_v11 = vpop.permute.xlu1 %224 }
 0x295   :  { %226 = vst [vmem:[%s407_s6] sm:$0xff] %v225_v11 }
 0x296   :  { %239 = vsyncpa [#allocation8], 1 }

</bundles_post_ra>
